<compile_context>
chip_gen: v7x
topology: tpu7x:2x2x1
jax: 0.10.0
libtpu: 0.0.40
codegen_flags: <defaults>
</compile_context>

<pallas_src>
import jax
import jax.numpy as jnp
from jax import lax
from jax.experimental import pallas as pl
from jax.experimental.pallas import tpu as pltpu


def _make_kernel(W, L, HALO, Cin, Cmid, Cout):
    """Row-tile kernel on lane-dense (C, L) slabs, L = tile_rows * W."""

    def kernel(x_ref, xup_ref, xdn_ref,
               w1_ref, b1_ref, w2_ref, b2_ref, w3_ref, b3_ref,
               out_ref, h1ext_ref, im2col_ref):
        r = pl.program_id(1)
        at_top = r == 0
        at_bot = r == pl.num_programs(1) - 1

        x = x_ref[0]                                       # (Cin, L) bf16

        # ---- conv1 (1x1, BN scale folded into w1) + bias + ReLU ------------
        h1 = jnp.dot(w1_ref[...], x, preferred_element_type=jnp.float32)
        h1 = jnp.maximum(h1 + b1_ref[...], 0.0)            # (Cmid, L) f32

        # ---- conv1 on the one-row halos (row above / below the tile) -------
        xup = xup_ref[0, :, HALO - W:HALO]                 # (Cin, W) bf16
        xdn = xdn_ref[0, :, 0:W]                           # (Cin, W) bf16
        h1u = jnp.maximum(
            jnp.dot(w1_ref[...], xup, preferred_element_type=jnp.float32)
            + b1_ref[...], 0.0)
        h1d = jnp.maximum(
            jnp.dot(w1_ref[...], xdn, preferred_element_type=jnp.float32)
            + b1_ref[...], 0.0)
        # At the image boundary the halo row does not exist -> zero (pad=1).
        h1u = jnp.where(at_top, 0.0, h1u)
        h1d = jnp.where(at_bot, 0.0, h1d)

        # ---- assemble haloed h1 into a 128-lane-aligned bf16 VMEM scratch --
        zpad = jnp.zeros((Cmid, HALO), jnp.bfloat16)
        h1ext_ref[:, 0:HALO] = zpad
        h1ext_ref[:, HALO - W:HALO] = h1u.astype(jnp.bfloat16)
        h1ext_ref[:, HALO:HALO + L] = h1.astype(jnp.bfloat16)
        h1ext_ref[:, HALO + L:HALO + L + HALO] = zpad
        h1ext_ref[:, HALO + L:HALO + L + W] = h1d.astype(jnp.bfloat16)

        # ---- im2col: 9 taps stored straight into bf16 VMEM scratch ---------
        # Column-edge masks computed ONCE, in the patch dtype, pre-broadcast.
        col = lax.broadcasted_iota(jnp.int32, (1, L), 1) % W
        mask_l = jnp.broadcast_to((col >= 1).astype(jnp.bfloat16), (Cmid, L))
        mask_r = jnp.broadcast_to((col < (W - 1)).astype(jnp.bfloat16), (Cmid, L))
        for kh in range(3):
            for kw in range(3):
                d = (kh - 1) * W + (kw - 1)
                patch = h1ext_ref[:, HALO + d:HALO + d + L]     # (Cmid, L) bf16
                if kw == 0:
                    patch = patch * mask_l
                elif kw == 2:
                    patch = patch * mask_r
                t = kh * 3 + kw
                im2col_ref[t * Cmid:(t + 1) * Cmid, :] = patch

        # ---- conv2 (3x3) as ONE fused K=9*Cmid MXU matmul + bias + ReLU ----
        h2 = jnp.dot(w2_ref[...], im2col_ref[...],
                     preferred_element_type=jnp.float32)
        h2 = jnp.maximum(h2 + b2_ref[...], 0.0)            # (Cmid, L) f32

        # ---- conv3 (1x1) + BN bias + residual add + ReLU (f32 in-register) -
        h3 = jnp.dot(w3_ref[...], h2.astype(jnp.bfloat16),
                     preferred_element_type=jnp.float32)   # (Cout, L) f32
        out = jnp.maximum(h3 + b3_ref[...] + x.astype(jnp.float32), 0.0)
        out_ref[0] = out.astype(out_ref.dtype)             # single bf16 store

    return kernel


def fold_bn(gamma, beta, running_mean, running_var, eps=1e-5):
    scale = gamma / jnp.sqrt(running_var + eps)
    bias = beta - running_mean * scale
    return scale, bias


def _pick_tile_rows(H, W):
    """Smallest row count dividing H with a 128-multiple lane width."""
    for tr in range(1, H):
        if H % tr == 0 and (tr * W) % 128 == 0:
            return tr
    return H  # fallback: whole sample per grid step


def bottleneck_forward(x, conv1_w, bn1, conv2_w, bn2, conv3_w, bn3, eps=1e-5):
    """x: (N, Cin, H, W) NCHW; conv*_w: PyTorch OIHW; bn* = (gamma, beta,
    running_mean, running_var). Returns (N, Cout, H, W) bf16 with Cout == Cin."""
    N, Cin, H, W = x.shape
    Cmid = conv1_w.shape[0]
    Cout = conv3_w.shape[0]
    S = H * W
    assert Cout == Cin, "residual add (downsample=None) needs inplanes == planes*expansion"
    assert conv2_w.shape == (Cmid, Cmid, 3, 3)
    assert H >= 2 and W <= 127, "row-halo tiling assumes W<=127 and H>=2"

    s1, b1 = fold_bn(*bn1, eps=eps)
    s2, b2 = fold_bn(*bn2, eps=eps)
    s3, b3 = fold_bn(*bn3, eps=eps)

    # Fold BN scale into conv weights, lay out as (out_rows, K_cols), cast bf16.
    w1k = (conv1_w[:, :, 0, 0] * s1[:, None]).astype(jnp.bfloat16)            # (Cmid, Cin)
    w2k = (jnp.transpose(conv2_w, (0, 2, 3, 1)).reshape(Cmid, 9 * Cmid)
           * s2[:, None]).astype(jnp.bfloat16)                                # (Cmid, 9*Cmid)
    w3k = (conv3_w[:, :, 0, 0] * s3[:, None]).astype(jnp.bfloat16)            # (Cout, Cmid)
    b1k = b1.reshape(Cmid, 1).astype(jnp.float32)
    b2k = b2.reshape(Cmid, 1).astype(jnp.float32)
    b3k = b3.reshape(Cout, 1).astype(jnp.float32)

    # Lane-dense layout, bf16 across HBM: channels on sublanes, H*W on lanes.
    x_flat = x.reshape(N, Cin, S).astype(jnp.bfloat16)

    TR = _pick_tile_rows(H, W)           # rows per tile
    R = H // TR                          # row tiles per sample
    L = TR * W                           # lanes per tile (multiple of 128 if R > 1)

    if R > 1:
        HALO = 128
        LB = L // 128                    # 128-lane blocks per row tile
        NB = S // 128                    # total 128-lane blocks per sample
        up_map = lambda n, r: (n, 0, jnp.maximum(r * LB - 1, 0))
        dn_map = lambda n, r: (n, 0, jnp.minimum((r + 1) * LB, NB - 1))
    else:
        HALO = min(128, L)
        up_map = lambda n, r: (n, 0, 0)  # contents unused (zeroed at boundary)
        dn_map = lambda n, r: (n, 0, 0)
    assert HALO >= W + 1

    kernel = _make_kernel(W, L, HALO, Cin, Cmid, Cout)

    flops = 2 * N * S * (Cin * Cmid + 9 * Cmid * Cmid + Cmid * Cout)
    bytes_accessed = (N * Cin * S * 2 + N * Cout * S * 2            # bf16 act I/O
                      + N * R * 2 * Cin * HALO * 2                  # halo re-reads
                      + (w1k.size + w2k.size + w3k.size) * 2
                      + (b1k.size + b2k.size + b3k.size) * 4)

    out_flat = pl.pallas_call(
        kernel,
        out_shape=jax.ShapeDtypeStruct((N, Cout, S), jnp.bfloat16),
        grid_spec=pltpu.PrefetchScalarGridSpec(
            num_scalar_prefetch=0,
            grid=(N, R),
            in_specs=[
                pl.BlockSpec((1, Cin, L), lambda n, r: (n, 0, r)),      # main tile
                pl.BlockSpec((1, Cin, HALO), up_map),                   # row above
                pl.BlockSpec((1, Cin, HALO), dn_map),                   # row below
                pl.BlockSpec((Cmid, Cin), lambda n, r: (0, 0)),
                pl.BlockSpec((Cmid, 1), lambda n, r: (0, 0)),
                pl.BlockSpec((Cmid, 9 * Cmid), lambda n, r: (0, 0)),
                pl.BlockSpec((Cmid, 1), lambda n, r: (0, 0)),
                pl.BlockSpec((Cout, Cmid), lambda n, r: (0, 0)),
                pl.BlockSpec((Cout, 1), lambda n, r: (0, 0)),
            ],
            out_specs=pl.BlockSpec((1, Cout, L), lambda n, r: (n, 0, r)),
            scratch_shapes=[
                pltpu.VMEM((Cmid, HALO + L + HALO), jnp.bfloat16),  # haloed h1
                pltpu.VMEM((9 * Cmid, L), jnp.bfloat16),            # im2col
            ],
        ),
        compiler_params=pltpu.CompilerParams(
            dimension_semantics=("parallel", "parallel"),
            vmem_limit_bytes=32 * 1024 * 1024),
        cost_estimate=pl.CostEstimate(flops=flops, transcendentals=0,
                                      bytes_accessed=bytes_accessed),
    )(x_flat, x_flat, x_flat, w1k, b1k, w2k, b2k, w3k, b3k)

    return out_flat.reshape(N, Cout, H, W)


def reference_forward(x, conv1_w, bn1, conv2_w, bn2, conv3_w, bn3, eps=1e-5):
    """Pure-JAX f32 NCHW/OIHW reference (eval-mode BN) for correctness check."""
    dn = ('NCHW', 'OIHW', 'NCHW')

    def bn_apply(h, p):
        gamma, beta, mean, var = p
        s = gamma / jnp.sqrt(var + eps)
        b = beta - mean * s
        return h * s.reshape(1, -1, 1, 1) + b.reshape(1, -1, 1, 1)

    h = lax.conv_general_dilated(x, conv1_w, (1, 1), 'VALID', dimension_numbers=dn)
    h = jnp.maximum(bn_apply(h, bn1), 0.0)
    h = lax.conv_general_dilated(h, conv2_w, (1, 1), ((1, 1), (1, 1)),
                                 dimension_numbers=dn)
    h = jnp.maximum(bn_apply(h, bn2), 0.0)
    h = lax.conv_general_dilated(h, conv3_w, (1, 1), 'VALID', dimension_numbers=dn)
    h = bn_apply(h, bn3)
    return jnp.maximum(h + x, 0.0)


if __name__ == "__main__":
    # Module config: planes=4, expansion=4 -> inplanes=16, width=4
    # (base_width=64, groups=1, stride=1, downsample=None).
    N, H, W = 2, 16, 16
    planes, expansion = 4, 4
    inplanes = planes * expansion          # 16 (required for residual add)
    width = planes                         # 4

    key = jax.random.PRNGKey(0)
    ks = jax.random.split(key, 8)

    x = jax.random.normal(ks[0], (N, inplanes, H, W), jnp.float32)

    # Conv weights in PyTorch OIHW layout.
    conv1_w = 0.1 * jax.random.normal(ks[1], (width, inplanes, 1, 1), jnp.float32)
    conv2_w = 0.1 * jax.random.normal(ks[2], (width, width, 3, 3), jnp.float32)
    conv3_w = 0.1 * jax.random.normal(ks[3], (planes * expansion, width, 1, 1),
                                      jnp.float32)

    def bn_params(k, c):
        k1, k2, k3, k4 = jax.random.split(k, 4)
        gamma = 1.0 + 0.1 * jax.random.normal(k1, (c,), jnp.float32)
        beta = 0.1 * jax.random.normal(k2, (c,), jnp.float32)
        rmean = 0.1 * jax.random.normal(k3, (c,), jnp.float32)
        rvar = 1.0 + 0.1 * jax.random.uniform(k4, (c,), jnp.float32)
        return (gamma, beta, rmean, rvar)

    bn1 = bn_params(ks[4], width)
    bn2 = bn_params(ks[5], width)
    bn3 = bn_params(ks[6], planes * expansion)

    out = bottleneck_forward(x, conv1_w, bn1, conv2_w, bn2, conv3_w, bn3)
    out = jax.block_until_ready(out)

    ref = reference_forward(x, conv1_w, bn1, conv2_w, bn2, conv3_w, bn3)
    assert out.shape == (N, planes * expansion, H, W)
    assert out.dtype == jnp.bfloat16
    # bf16 activations across HBM + bf16 MXU operands (f32 accumulate)
    # => loosened tolerance vs the f32 reference.
    assert jnp.allclose(out.astype(jnp.float32), ref, atol=5e-2, rtol=5e-2), \
        "mismatch vs reference"

    print("KERNEL_OK")
</pallas_src>

<mosaic_0001>
module attributes {stable_mosaic.version = 11 : i64} {
  func.func @kernel(%arg0: i32, %arg1: i32, %arg2: memref<1x16x128xbf16, #tpu.memory_space<vmem>>, %arg3: memref<1x16x128xbf16, #tpu.memory_space<vmem>>, %arg4: memref<1x16x128xbf16, #tpu.memory_space<vmem>>, %arg5: memref<4x16xbf16, #tpu.memory_space<vmem>>, %arg6: memref<4x1xf32, #tpu.memory_space<vmem>>, %arg7: memref<4x36xbf16, #tpu.memory_space<vmem>>, %arg8: memref<4x1xf32, #tpu.memory_space<vmem>>, %arg9: memref<16x4xbf16, #tpu.memory_space<vmem>>, %arg10: memref<16x1xf32, #tpu.memory_space<vmem>>, %arg11: memref<1x16x128xbf16, #tpu.memory_space<vmem>>, %arg12: memref<4x384xbf16, #tpu.memory_space<vmem>>, %arg13: memref<36x128xbf16, #tpu.memory_space<vmem>>) attributes {dimension_semantics = [#tpu.dimension_semantics<parallel>, #tpu.dimension_semantics<parallel>], iteration_bounds = array<i64: 2, 2>, scalar_prefetch = 0 : i64, scratch_operands = 2 : i64, tpu.core_type = #tpu.core_type<tc>, window_params = [{transform_indices = @transform_0, window_bounds = array<i64: 1, 16, 128>}, {transform_indices = @transform_1, window_bounds = array<i64: 1, 16, 128>}, {transform_indices = @transform_2, window_bounds = array<i64: 1, 16, 128>}, {pipeline_mode = #tpu.pipeline_mode<synchronous>, transform_indices = @transform_3, window_bounds = array<i64: 4, 16>}, {pipeline_mode = #tpu.pipeline_mode<synchronous>, transform_indices = @transform_4, window_bounds = array<i64: 4, 1>}, {pipeline_mode = #tpu.pipeline_mode<synchronous>, transform_indices = @transform_5, window_bounds = array<i64: 4, 36>}, {pipeline_mode = #tpu.pipeline_mode<synchronous>, transform_indices = @transform_6, window_bounds = array<i64: 4, 1>}, {pipeline_mode = #tpu.pipeline_mode<synchronous>, transform_indices = @transform_7, window_bounds = array<i64: 16, 4>}, {pipeline_mode = #tpu.pipeline_mode<synchronous>, transform_indices = @transform_8, window_bounds = array<i64: 16, 1>}, {transform_indices = @transform_9, window_bounds = array<i64: 1, 16, 128>}]} {
    %c0_i32 = arith.constant 0 : i32
    %0 = arith.cmpi eq, %arg1, %c0_i32 : i32
    %c1_i32 = arith.constant 1 : i32
    %1 = arith.cmpi eq, %arg1, %c1_i32 : i32
    %c0 = arith.constant 0 : index
    %c0_0 = arith.constant 0 : index
    %c0_1 = arith.constant 0 : index
    %2 = vector.load %arg2[%c0, %c0_0, %c0_1] : memref<1x16x128xbf16, #tpu.memory_space<vmem>>, vector<1x16x128xbf16>
    %3 = vector.shape_cast %2 : vector<1x16x128xbf16> to vector<16x128xbf16>
    %c0_2 = arith.constant 0 : index
    %c0_3 = arith.constant 0 : index
    %4 = vector.load %arg5[%c0_2, %c0_3] : memref<4x16xbf16, #tpu.memory_space<vmem>>, vector<4x16xbf16>
    %cst = arith.constant dense<0.000000e+00> : vector<4x128xf32>
    %5 = tpu.matmul %4, %3, %cst {dimension_numbers = #tpu.dot_dimension_numbers<[1], [0], [0], [1], [0, 0, 1, 1], [], []>} : vector<4x16xbf16>, vector<16x128xbf16>, vector<4x128xf32> -> vector<4x128xf32>
    %c0_4 = arith.constant 0 : index
    %c0_5 = arith.constant 0 : index
    %6 = vector.load %arg6[%c0_4, %c0_5] : memref<4x1xf32, #tpu.memory_space<vmem>>, vector<4x1xf32>
    %7 = vector.broadcast %6 : vector<4x1xf32> to vector<4x128xf32>
    %8 = arith.addf %5, %7 : vector<4x128xf32>
    %cst_6 = arith.constant 0.000000e+00 : f32
    %9 = vector.broadcast %cst_6 : f32 to vector<4x128xf32>
    %10 = arith.maximumf %8, %9 : vector<4x128xf32>
    %c0_7 = arith.constant 0 : index
    %c0_8 = arith.constant 0 : index
    %c112 = arith.constant 112 : index
    %11 = vector.load %arg3[%c0_7, %c0_8, %c112] : memref<1x16x128xbf16, #tpu.memory_space<vmem>>, vector<1x16x16xbf16>
    %12 = vector.shape_cast %11 : vector<1x16x16xbf16> to vector<16x16xbf16>
    %c0_9 = arith.constant 0 : index
    %c0_10 = arith.constant 0 : index
    %c0_11 = arith.constant 0 : index
    %13 = vector.load %arg4[%c0_9, %c0_10, %c0_11] : memref<1x16x128xbf16, #tpu.memory_space<vmem>>, vector<1x16x16xbf16>
    %14 = vector.shape_cast %13 : vector<1x16x16xbf16> to vector<16x16xbf16>
    %c0_12 = arith.constant 0 : index
    %c0_13 = arith.constant 0 : index
    %15 = vector.load %arg5[%c0_12, %c0_13] : memref<4x16xbf16, #tpu.memory_space<vmem>>, vector<4x16xbf16>
    %cst_14 = arith.constant dense<0.000000e+00> : vector<4x16xf32>
    %16 = tpu.matmul %15, %12, %cst_14 {dimension_numbers = #tpu.dot_dimension_numbers<[1], [0], [0], [1], [0, 0, 1, 1], [], []>} : vector<4x16xbf16>, vector<16x16xbf16>, vector<4x16xf32> -> vector<4x16xf32>
    %c0_15 = arith.constant 0 : index
    %c0_16 = arith.constant 0 : index
    %17 = vector.load %arg6[%c0_15, %c0_16] : memref<4x1xf32, #tpu.memory_space<vmem>>, vector<4x1xf32>
    %18 = vector.broadcast %17 : vector<4x1xf32> to vector<4x16xf32>
    %19 = arith.addf %16, %18 : vector<4x16xf32>
    %cst_17 = arith.constant 0.000000e+00 : f32
    %20 = vector.broadcast %cst_17 : f32 to vector<4x16xf32>
    %21 = arith.maximumf %19, %20 : vector<4x16xf32>
    %c0_18 = arith.constant 0 : index
    %c0_19 = arith.constant 0 : index
    %22 = vector.load %arg5[%c0_18, %c0_19] : memref<4x16xbf16, #tpu.memory_space<vmem>>, vector<4x16xbf16>
    %cst_20 = arith.constant dense<0.000000e+00> : vector<4x16xf32>
    %23 = tpu.matmul %22, %14, %cst_20 {dimension_numbers = #tpu.dot_dimension_numbers<[1], [0], [0], [1], [0, 0, 1, 1], [], []>} : vector<4x16xbf16>, vector<16x16xbf16>, vector<4x16xf32> -> vector<4x16xf32>
    %c0_21 = arith.constant 0 : index
    %c0_22 = arith.constant 0 : index
    %24 = vector.load %arg6[%c0_21, %c0_22] : memref<4x1xf32, #tpu.memory_space<vmem>>, vector<4x1xf32>
    %25 = vector.broadcast %24 : vector<4x1xf32> to vector<4x16xf32>
    %26 = arith.addf %23, %25 : vector<4x16xf32>
    %cst_23 = arith.constant 0.000000e+00 : f32
    %27 = vector.broadcast %cst_23 : f32 to vector<4x16xf32>
    %28 = arith.maximumf %26, %27 : vector<4x16xf32>
    %cst_24 = arith.constant 0.000000e+00 : f32
    %29 = vector.broadcast %cst_24 : f32 to vector<4x16xf32>
    %30 = arith.select %0, %29, %21 : vector<4x16xf32>
    %cst_25 = arith.constant 0.000000e+00 : f32
    %31 = vector.broadcast %cst_25 : f32 to vector<4x16xf32>
    %32 = arith.select %1, %31, %28 : vector<4x16xf32>
    %cst_26 = arith.constant 0.000000e+00 : bf16
    %33 = vector.broadcast %cst_26 : bf16 to vector<4x128xbf16>
    %c0_27 = arith.constant 0 : index
    %c0_28 = arith.constant 0 : index
    %34 = vector.load %arg12[%c0_27, %c0_28] : memref<4x384xbf16, #tpu.memory_space<vmem>>, vector<4x128xbf16>
    tpu.vector_store %arg12[%c0_27, %c0_28], %33 {strides = array<i32>} : memref<4x384xbf16, #tpu.memory_space<vmem>>, vector<4x128xbf16>,
    %35 = arith.truncf %30 : vector<4x16xf32> to vector<4x16xbf16>
    %c0_29 = arith.constant 0 : index
    %c112_30 = arith.constant 112 : index
    %36 = vector.load %arg12[%c0_29, %c112_30] : memref<4x384xbf16, #tpu.memory_space<vmem>>, vector<4x16xbf16>
    tpu.vector_store %arg12[%c0_29, %c112_30], %35 {strides = array<i32>} : memref<4x384xbf16, #tpu.memory_space<vmem>>, vector<4x16xbf16>,
    %37 = arith.truncf %10 : vector<4x128xf32> to vector<4x128xbf16>
    %c0_31 = arith.constant 0 : index
    %c128 = arith.constant 128 : index
    %38 = vector.load %arg12[%c0_31, %c128] : memref<4x384xbf16, #tpu.memory_space<vmem>>, vector<4x128xbf16>
    tpu.vector_store %arg12[%c0_31, %c128], %37 {strides = array<i32>} : memref<4x384xbf16, #tpu.memory_space<vmem>>, vector<4x128xbf16>,
    %c0_32 = arith.constant 0 : index
    %c256 = arith.constant 256 : index
    %39 = vector.load %arg12[%c0_32, %c256] : memref<4x384xbf16, #tpu.memory_space<vmem>>, vector<4x128xbf16>
    tpu.vector_store %arg12[%c0_32, %c256], %33 {strides = array<i32>} : memref<4x384xbf16, #tpu.memory_space<vmem>>, vector<4x128xbf16>,
    %40 = arith.truncf %32 : vector<4x16xf32> to vector<4x16xbf16>
    %c0_33 = arith.constant 0 : index
    %c256_34 = arith.constant 256 : index
    %41 = vector.load %arg12[%c0_33, %c256_34] : memref<4x384xbf16, #tpu.memory_space<vmem>>, vector<4x16xbf16>
    tpu.vector_store %arg12[%c0_33, %c256_34], %40 {strides = array<i32>} : memref<4x384xbf16, #tpu.memory_space<vmem>>, vector<4x16xbf16>,
    %42 = tpu.iota {dimensions = array<i32: 1>} : vector<1x128xi32>
    %c16_i32 = arith.constant 16 : i32
    %c0_i32_35 = arith.constant 0 : i32
    %43 = arith.cmpi eq, %c16_i32, %c0_i32_35 : i32
    %c1_i32_36 = arith.constant 1 : i32
    %44 = arith.select %43, %c1_i32_36, %c16_i32 : i32
    %45 = vector.broadcast %44 : i32 to vector<1x128xi32>
    %46 = arith.remsi %42, %45 : vector<1x128xi32>
    %c0_i32_37 = arith.constant 0 : i32
    %47 = vector.broadcast %c0_i32_37 : i32 to vector<1x128xi32>
    %48 = arith.cmpi ne, %46, %47 : vector<1x128xi32>
    %c0_i32_38 = arith.constant 0 : i32
    %49 = vector.broadcast %c0_i32_38 : i32 to vector<1x128xi32>
    %50 = arith.cmpi slt, %46, %49 : vector<1x128xi32>
    %c0_i32_39 = arith.constant 0 : i32
    %51 = arith.cmpi slt, %44, %c0_i32_39 : i32
    %52 = vector.broadcast %51 : i1 to vector<1x128xi1>
    %53 = vector.broadcast %52 : vector<1x128xi1> to vector<1x128xi1>
    %54 = arith.xori %50, %53 : vector<1x128xi1>
    %55 = arith.andi %54, %48 : vector<1x128xi1>
    %56 = vector.broadcast %44 : i32 to vector<1x128xi32>
    %57 = arith.addi %46, %56 : vector<1x128xi32>
    %58 = arith.select %55, %57, %46 : vector<1x128xi1>, vector<1x128xi32>
    %c1_i32_40 = arith.constant 1 : i32
    %59 = vector.broadcast %c1_i32_40 : i32 to vector<1x128xi32>
    %60 = arith.cmpi sge, %58, %59 : vector<1x128xi32>
    %61 = arith.extui %60 : vector<1x128xi1> to vector<1x128xi32>
    %62 = arith.sitofp %61 : vector<1x128xi32> to vector<1x128xf32>
    %63 = arith.truncf %62 : vector<1x128xf32> to vector<1x128xbf16>
    %64 = vector.shape_cast %63 : vector<1x128xbf16> to vector<1x128xbf16>
    %65 = vector.broadcast %64 : vector<1x128xbf16> to vector<4x128xbf16>
    %c15_i32 = arith.constant 15 : i32
    %66 = vector.broadcast %c15_i32 : i32 to vector<1x128xi32>
    %67 = arith.cmpi slt, %58, %66 : vector<1x128xi32>
    %68 = arith.extui %67 : vector<1x128xi1> to vector<1x128xi32>
    %69 = arith.sitofp %68 : vector<1x128xi32> to vector<1x128xf32>
    %70 = arith.truncf %69 : vector<1x128xf32> to vector<1x128xbf16>
    %71 = vector.shape_cast %70 : vector<1x128xbf16> to vector<1x128xbf16>
    %72 = vector.broadcast %71 : vector<1x128xbf16> to vector<4x128xbf16>
    %c0_41 = arith.constant 0 : index
    %c111 = arith.constant 111 : index
    %73 = vector.load %arg12[%c0_41, %c111] : memref<4x384xbf16, #tpu.memory_space<vmem>>, vector<4x128xbf16>
    %74 = arith.mulf %73, %65 : vector<4x128xbf16>
    %c0_42 = arith.constant 0 : index
    %c0_43 = arith.constant 0 : index
    %75 = vector.load %arg13[%c0_42, %c0_43] : memref<36x128xbf16, #tpu.memory_space<vmem>>, vector<4x128xbf16>
    tpu.vector_store %arg13[%c0_42, %c0_43], %74 {strides = array<i32>} : memref<36x128xbf16, #tpu.memory_space<vmem>>, vector<4x128xbf16>,
    %c0_44 = arith.constant 0 : index
    %c112_45 = arith.constant 112 : index
    %76 = vector.load %arg12[%c0_44, %c112_45] : memref<4x384xbf16, #tpu.memory_space<vmem>>, vector<4x128xbf16>
    %c4 = arith.constant 4 : index
    %c0_46 = arith.constant 0 : index
    %77 = vector.load %arg13[%c4, %c0_46] : memref<36x128xbf16, #tpu.memory_space<vmem>>, vector<4x128xbf16>
    tpu.vector_store %arg13[%c4, %c0_46], %76 {strides = array<i32>} : memref<36x128xbf16, #tpu.memory_space<vmem>>, vector<4x128xbf16>,
    %c0_47 = arith.constant 0 : index
    %c113 = arith.constant 113 : index
    %78 = vector.load %arg12[%c0_47, %c113] : memref<4x384xbf16, #tpu.memory_space<vmem>>, vector<4x128xbf16>
    %79 = arith.mulf %78, %72 : vector<4x128xbf16>
    %c8 = arith.constant 8 : index
    %c0_48 = arith.constant 0 : index
    %80 = vector.load %arg13[%c8, %c0_48] : memref<36x128xbf16, #tpu.memory_space<vmem>>, vector<4x128xbf16>
    tpu.vector_store %arg13[%c8, %c0_48], %79 {strides = array<i32>} : memref<36x128xbf16, #tpu.memory_space<vmem>>, vector<4x128xbf16>,
    %c0_49 = arith.constant 0 : index
    %c127 = arith.constant 127 : index
    %81 = vector.load %arg12[%c0_49, %c127] : memref<4x384xbf16, #tpu.memory_space<vmem>>, vector<4x128xbf16>
    %82 = arith.mulf %81, %65 : vector<4x128xbf16>
    %c12 = arith.constant 12 : index
    %c0_50 = arith.constant 0 : index
    %83 = vector.load %arg13[%c12, %c0_50] : memref<36x128xbf16, #tpu.memory_space<vmem>>, vector<4x128xbf16>
    tpu.vector_store %arg13[%c12, %c0_50], %82 {strides = array<i32>} : memref<36x128xbf16, #tpu.memory_space<vmem>>, vector<4x128xbf16>,
    %c0_51 = arith.constant 0 : index
    %c128_52 = arith.constant 128 : index
    %84 = vector.load %arg12[%c0_51, %c128_52] : memref<4x384xbf16, #tpu.memory_space<vmem>>, vector<4x128xbf16>
    %c16 = arith.constant 16 : index
    %c0_53 = arith.constant 0 : index
    %85 = vector.load %arg13[%c16, %c0_53] : memref<36x128xbf16, #tpu.memory_space<vmem>>, vector<4x128xbf16>
    tpu.vector_store %arg13[%c16, %c0_53], %84 {strides = array<i32>} : memref<36x128xbf16, #tpu.memory_space<vmem>>, vector<4x128xbf16>,
    %c0_54 = arith.constant 0 : index
    %c129 = arith.constant 129 : index
    %86 = vector.load %arg12[%c0_54, %c129] : memref<4x384xbf16, #tpu.memory_space<vmem>>, vector<4x128xbf16>
    %87 = arith.mulf %86, %72 : vector<4x128xbf16>
    %c20 = arith.constant 20 : index
    %c0_55 = arith.constant 0 : index
    %88 = vector.load %arg13[%c20, %c0_55] : memref<36x128xbf16, #tpu.memory_space<vmem>>, vector<4x128xbf16>
    tpu.vector_store %arg13[%c20, %c0_55], %87 {strides = array<i32>} : memref<36x128xbf16, #tpu.memory_space<vmem>>, vector<4x128xbf16>,
    %c0_56 = arith.constant 0 : index
    %c143 = arith.constant 143 : index
    %89 = vector.load %arg12[%c0_56, %c143] : memref<4x384xbf16, #tpu.memory_space<vmem>>, vector<4x128xbf16>
    %90 = arith.mulf %89, %65 : vector<4x128xbf16>
    %c24 = arith.constant 24 : index
    %c0_57 = arith.constant 0 : index
    %91 = vector.load %arg13[%c24, %c0_57] : memref<36x128xbf16, #tpu.memory_space<vmem>>, vector<4x128xbf16>
    tpu.vector_store %arg13[%c24, %c0_57], %90 {strides = array<i32>} : memref<36x128xbf16, #tpu.memory_space<vmem>>, vector<4x128xbf16>,
    %c0_58 = arith.constant 0 : index
    %c144 = arith.constant 144 : index
    %92 = vector.load %arg12[%c0_58, %c144] : memref<4x384xbf16, #tpu.memory_space<vmem>>, vector<4x128xbf16>
    %c28 = arith.constant 28 : index
    %c0_59 = arith.constant 0 : index
    %93 = vector.load %arg13[%c28, %c0_59] : memref<36x128xbf16, #tpu.memory_space<vmem>>, vector<4x128xbf16>
    tpu.vector_store %arg13[%c28, %c0_59], %92 {strides = array<i32>} : memref<36x128xbf16, #tpu.memory_space<vmem>>, vector<4x128xbf16>,
    %c0_60 = arith.constant 0 : index
    %c145 = arith.constant 145 : index
    %94 = vector.load %arg12[%c0_60, %c145] : memref<4x384xbf16, #tpu.memory_space<vmem>>, vector<4x128xbf16>
    %95 = arith.mulf %94, %72 : vector<4x128xbf16>
    %c32 = arith.constant 32 : index
    %c0_61 = arith.constant 0 : index
    %96 = vector.load %arg13[%c32, %c0_61] : memref<36x128xbf16, #tpu.memory_space<vmem>>, vector<4x128xbf16>
    tpu.vector_store %arg13[%c32, %c0_61], %95 {strides = array<i32>} : memref<36x128xbf16, #tpu.memory_space<vmem>>, vector<4x128xbf16>,
    %c0_62 = arith.constant 0 : index
    %c0_63 = arith.constant 0 : index
    %97 = vector.load %arg7[%c0_62, %c0_63] : memref<4x36xbf16, #tpu.memory_space<vmem>>, vector<4x36xbf16>
    %c0_64 = arith.constant 0 : index
    %c0_65 = arith.constant 0 : index
    %98 = vector.load %arg13[%c0_64, %c0_65] : memref<36x128xbf16, #tpu.memory_space<vmem>>, vector<36x128xbf16>
    %cst_66 = arith.constant dense<0.000000e+00> : vector<4x128xf32>
    %99 = tpu.matmul %97, %98, %cst_66 {dimension_numbers = #tpu.dot_dimension_numbers<[1], [0], [0], [1], [0, 0, 1, 1], [], []>} : vector<4x36xbf16>, vector<36x128xbf16>, vector<4x128xf32> -> vector<4x128xf32>
    %c0_67 = arith.constant 0 : index
    %c0_68 = arith.constant 0 : index
    %100 = vector.load %arg8[%c0_67, %c0_68] : memref<4x1xf32, #tpu.memory_space<vmem>>, vector<4x1xf32>
    %101 = vector.broadcast %100 : vector<4x1xf32> to vector<4x128xf32>
    %102 = arith.addf %99, %101 : vector<4x128xf32>
    %cst_69 = arith.constant 0.000000e+00 : f32
    %103 = vector.broadcast %cst_69 : f32 to vector<4x128xf32>
    %104 = arith.maximumf %102, %103 : vector<4x128xf32>
    %c0_70 = arith.constant 0 : index
    %c0_71 = arith.constant 0 : index
    %105 = vector.load %arg9[%c0_70, %c0_71] : memref<16x4xbf16, #tpu.memory_space<vmem>>, vector<16x4xbf16>
    %106 = arith.truncf %104 : vector<4x128xf32> to vector<4x128xbf16>
    %cst_72 = arith.constant dense<0.000000e+00> : vector<16x128xf32>
    %107 = tpu.matmul %105, %106, %cst_72 {dimension_numbers = #tpu.dot_dimension_numbers<[1], [0], [0], [1], [0, 0, 1, 1], [], []>} : vector<16x4xbf16>, vector<4x128xbf16>, vector<16x128xf32> -> vector<16x128xf32>
    %c0_73 = arith.constant 0 : index
    %c0_74 = arith.constant 0 : index
    %108 = vector.load %arg10[%c0_73, %c0_74] : memref<16x1xf32, #tpu.memory_space<vmem>>, vector<16x1xf32>
    %109 = vector.broadcast %108 : vector<16x1xf32> to vector<16x128xf32>
    %110 = arith.addf %107, %109 : vector<16x128xf32>
    %111 = arith.extf %3 : vector<16x128xbf16> to vector<16x128xf32>
    %112 = arith.addf %110, %111 : vector<16x128xf32>
    %cst_75 = arith.constant 0.000000e+00 : f32
    %113 = vector.broadcast %cst_75 : f32 to vector<16x128xf32>
    %114 = arith.maximumf %112, %113 : vector<16x128xf32>
    %115 = arith.truncf %114 : vector<16x128xf32> to vector<16x128xbf16>
    %c0_76 = arith.constant 0 : index
    %c0_77 = arith.constant 0 : index
    %c0_78 = arith.constant 0 : index
    %116 = vector.load %arg11[%c0_76, %c0_77, %c0_78] : memref<1x16x128xbf16, #tpu.memory_space<vmem>>, vector<1x16x128xbf16>
    %117 = vector.shape_cast %116 : vector<1x16x128xbf16> to vector<16x128xbf16>
    %118 = vector.shape_cast %115 : vector<16x128xbf16> to vector<1x16x128xbf16>
    tpu.vector_store %arg11[%c0_76, %c0_77, %c0_78], %118 {strides = array<i32>} : memref<1x16x128xbf16, #tpu.memory_space<vmem>>, vector<1x16x128xbf16>,
    return
  }
  func.func @transform_0(%arg0: i32, %arg1: i32) -> (i32, i32, i32) {
    %c0_i32 = arith.constant 0 : i32
    %c0_i32_0 = arith.constant 0 : i32
    return %arg0, %c0_i32, %arg1 : i32, i32, i32
  }
  func.func @transform_1(%arg0: i32, %arg1: i32) -> (i32, i32, i32) {
    %c1_i32 = arith.constant 1 : i32
    %0 = arith.muli %arg1, %c1_i32 : i32
    %c1_i32_0 = arith.constant 1 : i32
    %1 = arith.subi %0, %c1_i32_0 : i32
    %c0_i32 = arith.constant 0 : i32
    %2 = arith.maxsi %1, %c0_i32 : i32
    %c0_i32_1 = arith.constant 0 : i32
    %c0_i32_2 = arith.constant 0 : i32
    return %arg0, %c0_i32_1, %2 : i32, i32, i32
  }
  func.func @transform_2(%arg0: i32, %arg1: i32) -> (i32, i32, i32) {
    %c1_i32 = arith.constant 1 : i32
    %0 = arith.addi %arg1, %c1_i32 : i32
    %c1_i32_0 = arith.constant 1 : i32
    %1 = arith.muli %0, %c1_i32_0 : i32
    %c1_i32_1 = arith.constant 1 : i32
    %2 = arith.minsi %1, %c1_i32_1 : i32
    %c0_i32 = arith.constant 0 : i32
    %c0_i32_2 = arith.constant 0 : i32
    return %arg0, %c0_i32, %2 : i32, i32, i32
  }
  func.func @transform_3(%arg0: i32, %arg1: i32) -> (i32, i32) {
    %c0_i32 = arith.constant 0 : i32
    %c0_i32_0 = arith.constant 0 : i32
    %c0_i32_1 = arith.constant 0 : i32
    return %c0_i32, %c0_i32_0 : i32, i32
  }
  func.func @transform_4(%arg0: i32, %arg1: i32) -> (i32, i32) {
    %c0_i32 = arith.constant 0 : i32
    %c0_i32_0 = arith.constant 0 : i32
    %c0_i32_1 = arith.constant 0 : i32
    return %c0_i32, %c0_i32_0 : i32, i32
  }
  func.func @transform_5(%arg0: i32, %arg1: i32) -> (i32, i32) {
    %c0_i32 = arith.constant 0 : i32
    %c0_i32_0 = arith.constant 0 : i32
    %c0_i32_1 = arith.constant 0 : i32
    return %c0_i32, %c0_i32_0 : i32, i32
  }
  func.func @transform_6(%arg0: i32, %arg1: i32) -> (i32, i32) {
    %c0_i32 = arith.constant 0 : i32
    %c0_i32_0 = arith.constant 0 : i32
    %c0_i32_1 = arith.constant 0 : i32
    return %c0_i32, %c0_i32_0 : i32, i32
  }
  func.func @transform_7(%arg0: i32, %arg1: i32) -> (i32, i32) {
    %c0_i32 = arith.constant 0 : i32
    %c0_i32_0 = arith.constant 0 : i32
    %c0_i32_1 = arith.constant 0 : i32
    return %c0_i32, %c0_i32_0 : i32, i32
  }
  func.func @transform_8(%arg0: i32, %arg1: i32) -> (i32, i32) {
    %c0_i32 = arith.constant 0 : i32
    %c0_i32_0 = arith.constant 0 : i32
    %c0_i32_1 = arith.constant 0 : i32
    return %c0_i32, %c0_i32_0 : i32, i32
  }
  func.func @transform_9(%arg0: i32, %arg1: i32) -> (i32, i32, i32) {
    %c0_i32 = arith.constant 0 : i32
    %c0_i32_0 = arith.constant 0 : i32
    return %arg0, %c0_i32, %arg1 : i32, i32, i32
  }
}

</mosaic_0001>

<bundles_post_ra>
// kernel: tpu_custom_call.1
= control target key start
LH: loop header
LB: loop body
LE: loop exit
PB: predicated region body
PF: predicated region fallthrough
CT: control target
= control target key end

     0   :  { %s2200_s0 = inlined_call_operand.vmem [shape: bf16[2,16,256], index: 0, kind: input, shape index: {}]   ;;  %s2201_s1 = inlined_call_operand.hbm [shape: bf16[2,16,256], index: 1, kind: input, shape index: {}]   ;;  %s2202_s2 = inlined_call_operand.hbm [shape: bf16[2,16,256], index: 2, kind: input, shape index: {}]   ;;  %s2203_s3 = inlined_call_operand.vmem [shape: bf16[4,16], index: 3, kind: input, shape index: {}]   ;;  %s2204_s4 = inlined_call_operand.vmem [shape: f32[4,1], index: 4, kind: input, shape index: {}]   ;;  %s2205_s5 = inlined_call_operand.vmem [shape: bf16[4,36], index: 5, kind: input, shape index: {}]   ;;  %s2206_s6 = inlined_call_operand.vmem [shape: f32[4,1], index: 6, kind: input, shape index: {}]   ;;  %s2207_s7 = inlined_call_operand.vmem [shape: bf16[16,4], index: 7, kind: input, shape index: {}]   ;;  %s2208_s8 = inlined_call_operand.vmem [shape: f32[16,1], index: 8, kind: input, shape index: {}]   ;;  %s2209_s9 = inlined_call_operand.hbm [shape: bf16[2,16,256], index: 9, kind: output, shape index: {}]  }
   0x1   :  { %2223 = sst [smem:[#allocation26_spill]] %s2200_s0 }
   0x2   :  { %2224 = sst [smem:[#allocation27_spill]] %s2201_s1 }
   0x3   :  { %2225 = sst [smem:[#allocation28_spill]] %s2205_s5 }
   0x4   :  { %2226 = sst [smem:[#allocation29_spill]] %s2207_s7 }
   0x5   :  { %2227 = sst [smem:[#allocation30_spill]] %s2209_s9 }
   0x6   :  { %14 = vsyncpa [#allocation6], 0 }
   0x7   :  { %16 = vsyncpa [#allocation6 + $0x1], 0 }
   0x8   :  { %17 = vsyncpa [#allocation9], 0 }
   0x9   :  { %19 = vsyncpa [#allocation9 + $0x1], 0 }
   0xa   :  { %20 = vsyncpa [#allocation7], 0 }
   0xb   :  { %22 = vsyncpa [#allocation7 + $0x1], 0  ;;  %s1743_s30 = smov 0   ;;  %s1745_s10 = smov 0  }
   0xc   :  { %s1747_s11 = smov 0   ;;  %s1749_s12 = smov 0  }
   0xd   :  { %s1751_s13 = smov 0   ;;  %s1753_s14 = smov 0  }
   0xe   :  { %s1755_s15 = smov 0   ;;  %s1757_s16 = smov 0  }
   0xf   :  { %s1759_s17 = smov 0   ;;  %s1761_s18 = smov 0  }
  0x10   :  { %s1763_s19 = smov 0   ;;  %s1765_s20 = smov 0  }
  0x11   :  { %s1767_s21 = smov 0   ;;  %s1769_s22 = smov 0  }
  0x12 LB: > { %2228 = sst [smem:[#allocation14_spill]] %s1618_s30  ;;  %s37_s25 = sadd.s32 1, %s1662_s20  ;;  %s1670_s22 = sphi %s1769_s22, %s28_s22   ;;  %s1666_s21 = sphi %s1767_s21, %s2282_s21   ;;  %s1662_s20 = sphi %s1765_s20, %s2281_s20   ;;  %s1658_s19 = sphi %s1763_s19, %s2280_s19   ;;  %s1654_s18 = sphi %s1761_s18, %s2279_s18   ;;  %s1650_s17 = sphi %s1759_s17, %s2268_s17   ;;  %s1646_s16 = sphi %s1757_s16, %s2278_s16   ;;  %s1642_s15 = sphi %s1755_s15, %s2266_s15   ;;  %s1638_s14 = sphi %s1753_s14, %s2277_s14   ;;  %s1634_s13 = sphi %s1751_s13, %s2276_s13   ;;  %s1630_s12 = sphi %s1749_s12, %s2275_s12   ;;  %s1626_s11 = sphi %s1747_s11, %s2274_s11   ;;  %s1622_s10 = sphi %s1745_s10, %s2273_s10   ;;  %s1618_s30 = sphi %s1743_s30, %s2272_s30  }
  0x13   : > { %2229 = sst [smem:[#allocation15_spill]] %s1642_s15  ;;  %s40_s26 = sadd.s32 1, %s1666_s21 }
  0x14   : > { %2230 = sst [smem:[#allocation16_spill]] %s1650_s17  ;;  %p38_p0 = scmp.ge.s32.totalorder %s37_s25, 2 }
  0x15   : > { %2231 = sst [smem:[#allocation17_spill]] %s1658_s19  ;;  %s49_s27 = sadd.s32 1, %s1650_s17 }
  0x16   : > { %2232 = sst [smem:[#allocation18_spill]] %s1662_s20  ;;  %p56_p1 = scmp.ne.s32.totalorder %s1650_s17, %s1646_s16 }
  0x17   : > { %p57_p2 = scmp.eq.s32.totalorder %s1670_s22, 0  ;;  %s2284_s25 = smov (%p38_p0, %s37_s25), 0 }
  0x18   : > { %2233 = sst [smem:[#allocation19_spill]] %s2284_s25  ;;  %s2286_s26 = smov (!%p38_p0, %s40_s26), %s1666_s21 }
  0x19   : > { %s45_s28 = ssub.s32 %s1662_s20, %s2284_s25  ;;  %p1831_p3 = por %p57_p2, %p56_p1 }
  0x1a   : > { %p42_p4 = scmp.ge.s32.totalorder %s2286_s26, 2  ;;  %s83_s25 = sadd.s32 1, %s1642_s15 }
  0x1b   : > { %p90_p6 = scmp.ne.s32.totalorder %s1642_s15, %s1638_s14  ;;  %p96_p8 = scmp.ne.s32.totalorder %s1638_s14, %s1634_s13 }
  0x1c   : > { %s2288_s26 = smov (%p42_p4, %s2286_s26), 0  ;;  %s117_s19 = sadd.s32 1, %s1630_s12 }
  0x1d   : > { %2235 = sst [smem:[#allocation20_spill]] %s2288_s26  ;;  %s44_s24 = ssub.s32 %s1666_s21, %s2288_s26 }
  0x1e   : > { %s46_s23 = sor.u32 %s45_s28, %s44_s24  ;;  %p1847_p7 = por %p90_p6, %p57_p2 }
  0x1f   : > { %p47_p5 = scmp.eq.s32.totalorder %s46_s23, 0  ;;  %p81_p9 = scmp.eq.s32.totalorder %s44_s24, 0 }
  0x20   : > { %s2238_s28 = sadd.s32 4294967295, %s1670_s22   ;;  %p124_p12 = scmp.ne.s32.totalorder %s1630_s12, %s1626_s11 }
  0x21   : > { %s1843_s9 = scalar_select %p47_p5, %s1650_s17, %s49_s27  }
  0x22   : > { %p97_p10 = scmp.eq.s32.totalorder %s2238_s28, 0  ;;  %p130_p13 = scmp.ne.s32.totalorder %s1626_s11, %s1622_s10 }
  0x23   : > { %2236 = sst [smem:[#allocation21_spill]] %s1843_s9  ;;  %p1869_p0 = por %p124_p12, %p57_p2 }
  0x24   : > { %s1856_s26 = scalar_select %p81_p9, %s1642_s15, %s83_s25  }
  0x25   : > { %p1858_p11 = por %p97_p10, %p96_p8  ;;  %p1873_p4 = por %p130_p13, %p97_p10 }
  0x26   : > { %2239 = sst [smem:[#allocation22_spill]] %s1856_s26  ;;  %s2243_s13 = smov %s2238_s28 }
  0x27   : > { %s2240_s23 = scalar_select %p1858_p11, 1, 0 }
  0x28   : > { %s2242_s9 = scalar_select %p1873_p4, 1, 0 }
  0x29   : > { %p282_p5 = scmp.eq.s32.totalorder %s2243_s13, 3  ;;  %p287_p6 = scmp.ne.s32.totalorder %s1646_s16, %s1618_s30 }
  0x2a   : > { %s1882_s24 = scalar_select %p81_p9, %s1630_s12, %s117_s19  }
  0x2b   : > { %p1887_p8 = por %p282_p5, %p56_p1  ;;  %s2247_s10 = sadd.s32 4294967294, %s1670_s22  }
  0x2c   : > { %2244 = sst [smem:[#allocation23_spill]] %s1882_s24  ;;  %p288_p11 = scmp.eq.s32.totalorder %s2247_s10, 3 }
  0x2d   : > { %s2245_s25 = scalar_select %p1887_p8, 1, 0 }
  0x2e   : > { %p1893_p2 = por %p288_p11, %p287_p6  ;;  %p1217_p10 = scmp.ge.s32.totalorder %s1670_s22, 4 }
  0x2f   : > { %2246 = sst [smem:[#allocation24_spill]] %s2245_s25 }
  0x30   : > { %s2248_s28 = scalar_select %p1893_p2, 1, 0 }
  0x31   : > { %322 = sbr.rel (%p1217_p10) target bundleno = 122 (0x7a), region = 40 }
  0x32   : > { %2249 = sst [smem:[#allocation25_spill]] %s2248_s28 }
  0x38   : > { %325 = sbr.rel (!%p1831_p3) target bundleno = 67 (0x43), region = 44  ;;  %s327_s19 = sand.u32 (%p1831_p3), 1, %s1650_s17  }
  0x39   : > { %s1219_s13 = sshll.u32 (%p1831_p3), %s1666_s21, 2  ;;  %s1218_s26 = sshll.u32 (%p1831_p3), %s327_s19, 3 }
  0x3a   : > { %s331_s24 = sadd.s32 (%p1831_p3), %s1662_s20, %s1219_s13  ;;  %s2250_s0 = sld [smem:[#allocation26_spill]] (%p1831_p3) }
  0x3b   : > { %s1220_s30 = sshll.u32 (%p1831_p3), %s331_s24, 2  ;;  %s329_s28 = scalar_lea.vmem (%p1831_p3), [#allocation4], %s1218_s26 }
  0x40   : > { %s333_s5 = scalar_lea.vmem %s2250_s0, %s1220_s30 }
  0x41   : > { %v349_v0 = vld [vmem:[%s333_s5] sm:$0xf]  ;;  %v351_v1 = vld [vmem:[%s333_s5 + $0x8] sm:$0xf] }
  0x42   : > { %350 = vst [vmem:[%s329_s28] sm:$0xf] %v349_v0  ;;  %352 = vst [vmem:[%s329_s28 + $0x4] sm:$0xf] %v351_v1 }
  0x43 PF: > { %s380_s29 = sand.u32 1, %s1642_s15   ;;  %s1612_s19 = sshll.u32 %s1666_s21, 8 }
  0x44   : > { %s1221_s17 = sshll.u32 %s380_s29, 3  ;;  %s2251_s1 = sld [smem:[#allocation27_spill]] }
  0x45   : > { %s384_s13 = scalar_lea.vmem [#allocation5], %s1221_s17  ;;  %s405_s5 = sand.u32 1, %s1630_s12  }
  0x46   : > { %s395_s24 = sshll.u32 %s384_s13, 4  ;;  %s1918_s26 = scalar_lea.sflag [#allocation6], %s380_s29  ;;  %s1915_s24 = int_to_ptr.vmem [resolvable:$true] %s395_s24 }
  0x4a   : > { %s1913_s30 = scalar_lea.hbm %s2251_s1, %s1612_s19  ;;  %s1464_s20 = scalar_lea.hbm %s2251_s1, 512 }
  0x4b   : > { %s1460_s28 = scalar_lea.hbm %s1913_s30, 128  ;;  %p1465_p11 = scmp.lt.u32.totalorder %s1913_s30, %s2251_s1 }
  0x4c   : > { %p1461_p1 = scmp.ne.s32.totalorder %s1913_s30, %s1460_s28  ;;  %p1466_p12 = scmp.lt.u32.totalorder %s1464_s20, %s1460_s28 }
  0x4d   : > { %p1468_p5 = scmp.lt.u32.totalorder %s1460_s28, %s1913_s30 }
  0x4e   : > { %p1462_p3 = pnand %p1461_p1, %p1847_p7  ;;  %p1467_p13 = por %p1466_p12, %p1465_p11 }
  0x50   : > { %p1463_p9 = pneg %p1462_p3  ;;  %p1469_p6 = por %p1468_p5, %p1467_p13 }
  0x52   : > { %p1470_p10 = pnand %p1469_p6, %p1463_p9 }
  0x54   : > { %1473 = shalt.err (!%p1470_p10)
}
  0x55   : > { %s1474_s29 = scalar_lea.vmem %s1915_s24, 128  ;;  %s1672_s17 = smov [#allocation5]  }
  0x56   : > { %p1475_p1 = scmp.ne.s32.totalorder %s1915_s24, %s1474_s29  ;;  %s1478_s10 = sshll.u32 %s1672_s17, 4  ;;  %s1479_s10 = int_to_ptr.vmem [resolvable:$false] %s1478_s10 }
  0x57   : > { %s1480_s13 = scalar_lea.vmem %s1479_s10, 256  ;;  %p1481_p8 = scmp.lt.s32.totalorder %s1915_s24, %s1479_s10 }
  0x58   : > { %p1476_p3 = pnand %p1475_p1, %p1847_p7  ;;  %p1482_p4 = scmp.lt.s32.totalorder %s1480_s13, %s1474_s29 }
  0x5a   : > { %p1477_p2 = pneg %p1476_p3  ;;  %p1483_p11 = por %p1482_p4, %p1481_p8 }
  0x5c   : > { %p1484_p12 = pnand %p1483_p11, %p1477_p2 }
  0x5e   : > { %1487 = shalt.err (!%p1484_p12)
}
  0x5f   : > { %s1673_s28 = smov 128   ;;  %s1674_s20 = smov 64  }
  0x60   : > { %s1675_s25 = smov 4   ;;  %s1225_s29 = sshll.u32 %s405_s5, 3 }
  0x61   : > { %1307 = dma.hbm_to_vmem [thread:$0]  (%p1847_p7), %s1913_s30, 128, %s1915_s24, %s1918_s26, %s1673_s28, %s1674_s20, %s1675_s25  }
  0x62   : > { %s1614_s17 = sadd.s32 64, %s1612_s19  ;;  %s409_s10 = scalar_lea.vmem [#allocation8], %s1225_s29 }
  0x63   : > { %s420_s13 = sshll.u32 %s409_s10, 4  ;;  %s1952_s15 = scalar_lea.hbm %s2202_s2, %s1614_s17  ;;  %s1954_s13 = int_to_ptr.vmem [resolvable:$true] %s420_s13 }
  0x64   : > { %s1958_s7 = scalar_lea.sflag [#allocation9], %s405_s5  ;;  %s1488_s24 = scalar_lea.hbm %s1952_s15, 128 }
  0x65   : > { %p1489_p7 = scmp.ne.s32.totalorder %s1952_s15, %s1488_s24  ;;  %s1492_s0 = scalar_lea.hbm %s2202_s2, 512 }
  0x66   : > { %p1493_p2 = scmp.lt.u32.totalorder %s1952_s15, %s2202_s2  ;;  %p1494_p9 = scmp.lt.u32.totalorder %s1492_s0, %s1488_s24 }
  0x67   : > { %p1490_p4 = pnand %p1489_p7, %p1869_p0  ;;  %p1496_p5 = scmp.lt.u32.totalorder %s1488_s24, %s1952_s15 }
  0x68   : > { %p1495_p13 = por %p1494_p9, %p1493_p2 }
  0x69   : > { %p1491_p8 = pneg %p1490_p4 }
  0x6a   : > { %p1497_p6 = por %p1496_p5, %p1495_p13 }
  0x6c   : > { %p1498_p10 = pnand %p1497_p6, %p1491_p8 }
  0x6e   : > { %1501 = shalt.err (!%p1498_p10)
}
  0x6f   : > { %s1502_s5 = scalar_lea.vmem %s1954_s13, 128  ;;  %s1676_s29 = smov [#allocation8]  }
  0x70   : > { %p1503_p1 = scmp.ne.s32.totalorder %s1954_s13, %s1502_s5  ;;  %s1506_s17 = sshll.u32 %s1676_s29, 4  ;;  %s1507_s17 = int_to_ptr.vmem [resolvable:$false] %s1506_s17 }
  0x71   : > { %s1508_s10 = scalar_lea.vmem %s1507_s17, 256  ;;  %p1509_p12 = scmp.lt.s32.totalorder %s1954_s13, %s1507_s17 }
  0x72   : > { %p1504_p3 = pnand %p1503_p1, %p1869_p0  ;;  %p1510_p7 = scmp.lt.s32.totalorder %s1508_s10, %s1502_s5 }
  0x74   : > { %p1505_p11 = pneg %p1504_p3  ;;  %p1511_p4 = por %p1510_p7, %p1509_p12 }
  0x76   : > { %p1512_p2 = pnand %p1511_p4, %p1505_p11 }
  0x78   : > { %1515 = shalt.err (!%p1512_p2)
}
  0x79   : > { %1308 = dma.hbm_to_vmem [thread:$0]  (%p1869_p0), %s1952_s15, 128, %s1954_s13, %s1958_s7, %s1673_s28, %s1674_s20, %s1675_s25  }
  0x7a PF: > { %p1228_p8 = scmp.ge.s32.totalorder %s1670_s22, 1  ;;  %p428_p9 = scmp.lt.s32.totalorder %s1670_s22, 5 }
  0x7c   : > { %p429_p13 = pnand %p1228_p8, %p428_p9 }
  0x7d   : > { %s435_s24 = sand.u32 (!%p429_p13), 1, %s1646_s16   ;;  %s441_s27 = sand.u32 (!%p429_p13), 1, %s1638_s14  }
  0x7e   : > { %432 = sbr.rel (%p429_p13) target bundleno = 1222 (0x4c6), region = 93  ;;  %s1991_s19 = sshll.u32 (!%p429_p13), %s435_s24, 3 }
  0x7f   : > { %s1993_s30 = sshll.u32 (!%p429_p13), %s441_s27, 3  ;;  %s437_s15 = scalar_lea.vmem (!%p429_p13), [#allocation4], %s1991_s19 }
  0x80   : > { %s442_s28 = scalar_lea.sflag (!%p429_p13), [#allocation6], %s441_s27  ;;  %s445_s20 = scalar_lea.vmem (!%p429_p13), [#allocation5], %s1993_s30 }
  0x81   : > { %p2252_p0 = scmp.ne.s32.totalorder (!%p429_p13), %s2240_s23, 0 }
  0x85   : > { %1601 = dma.done.wait (%p2252_p0), %s442_s28, 128  }
  0x86   : > { %1603 = vsyncadd (%p2252_p0), %s442_s28, 4294967168  ;;  %s450_s25 = sand.u32 1, %s1626_s11   ;;  %p2253_p5 = scmp.ne.s32.totalorder %s2242_s9, 0 }
  0x87   : > { %s2002_s13 = sshll.u32 %s450_s25, 3  ;;  %s451_s7 = scalar_lea.sflag [#allocation9], %s450_s25 }
  0x88   : > { %s454_s0 = scalar_lea.vmem [#allocation8], %s2002_s13 }
  0x89   : > { %1605 = dma.done.wait (%p2253_p5), %s451_s7, 128  }
  0x8a   : > { %1607 = vsyncadd (%p2253_p5), %s451_s7, 4294967168  ;;  %v1677_v2 = vmov 0.0   ;;  %vm1678_vm0 = vmmov 0   ;;  %v1679_v3 = vmov 0   ;;  %v681_v4 = vlaneseq  ;;  %v1450_v11 = vld [vmem:[%s445_s20] sm:$0xff]   ;;  %v2017_v12 = vld [vmem:[%s437_s15] sm:$0xff]  }
  0x8b   : > { %1273 = vmatprep.subr.bf16.mxu0 %v1677_v2  ;;  %1275 = vmatprep.mubr.msk.bf16.mxu0 %vm1678_vm0, %v1677_v2  ;;  %692 = vst [vmem:[#allocation2 + $0x4] sm:$0x3] %v1679_v3  ;;  %675 = vst [vmem:[#allocation2] sm:$0x3] %v1679_v3  ;;  %v1680_v5 = vmov 1983009808  }
  0x8c   : > { %1279 = vmatprep.subr.bf16.mxu1 %v1677_v2  ;;  %1281 = vmatprep.mubr.msk.bf16.mxu1 %vm1678_vm0, %v1677_v2  ;;  %v679_v6 = vunpack.c.l.s4 %v1680_v5  ;;  %v697_v7 = vand.u32 127, %v681_v4  ;;  %v682_v9 = vshrl.u32 %v681_v4, 7  ;;  %s1681_s9 = smov 16   ;;  %v510_v14 = vld [vmem:[%s2204_s4] sm:$0xf]  ;;  %vm522_vm3 = vcmask 130048  }
  0x8d   : > { %1448 = vset.pattern.permute.xlu0 %v1679_v3  ;;  %1449 = vset.pattern.permute.xlu1 %v1679_v3  ;;  %v509_v17 = vld [vmem:[%s2203_s3] sm:$0x3]  ;;  %s1682_s29 = smov 113   ;;  %s1683_s17 = smov 15   ;;  %vm694_vm5 = vcmask 123904   ;;  %vm688_vm7 = vcmask 1042304  }
  0x8e   : > { %v680_v8 = vunpack.c.0.s8 %v679_v6  ;;  %v702_v10 = vand.u32 15, %v697_v7  ;;  %576 = vrot.lane.b32.xlu0 %v1450_v11, %s1681_s9  ;;  %1274 = vmatpush3.bf16.msra.mxu0 %v2017_v12  ;;  %v1452_v18 = vld [vmem:[%s454_s0] sm:$0xff]   ;;  %p506_p6 = scmp.eq.s32.totalorder %s1654_s18, 1  ;;  %p505_p10 = scmp.eq.s32.totalorder %s1654_s18, 0  ;;  %vm801_vm8 = vcmask 1039360   ;;  %vm793_vm9 = vcmask 121856  }
  0x8f   : > { %1285 = vmatprep.subr.bf16.mxu0 %v1677_v2  ;;  %s1684_s30 = smov 112   ;;  %s1685_s15 = smov 127   ;;  %vm817_vm10 = vcmask 7168   ;;  %vm730_vm11 = vcmask 908288   ;;  %vm745_vm12 = vcmask 138240   ;;  %vm778_vm13 = vcmask 924672  }
  0x90   : > { %vm714_vm1 = vcmp.lt.s32.totalorder %v702_v10, 15  ;;  %v2024_v15 = vsub.s32 %v680_v8, %v682_v9  ;;  %vm710_vm2 = vcmp.ge.s32.totalorder %v702_v10, 1  ;;  %s671_s10 = scalar_select %p506_p6, 1, 0  ;;  %vm879_vm14 = vcmask 916480  }
  0x91   : > { %v1240_v13 = vsel %vm714_vm1, 1.0, %v1677_v2  ;;  %v1239_v19 = vsel %vm710_vm2, 1.0, %v1677_v2  ;;  %1276 = vmatmul.mubr.msk.bf16.vlgmr.msra.gmra.mrb[0].mxu0 %vm522_vm3, %v509_v17  ;;  %s667_s27 = scalar_select %p505_p10, 1, 0  ;;  %vm935_vm15 = vcmask 1041408   ;;  %vm1000_vm1 = vcmask 31744  }
  0x92   : > { %v717_v16 = vpack.c.bf16 %v1240_v13, %v1240_v13  ;;  %513 = vperm.xlu0 %1448, %v510_v14   ;;  %v713_v21 = vpack.c.bf16 %v1239_v19, %v1239_v19  ;;  %1286 = vmatpush3.bf16.msra.mxu0 %v1452_v18  ;;  %v672_v32 = vstv %s671_s10  ;;  %s1686_s28 = smov 111   ;;  %s1687_s20 = smov 1  }
  0x93   : > { %1287 = vmatprep.mubr.msk.bf16.mxu0 %vm1678_vm0, %v1677_v2  ;;  %1301 = vmatprep.subr.bf16.mxu0 %v1677_v2  ;;  %vm673_vm4 = vcmp.eq.s32.totalorder %v672_v32, 1  ;;  %v668_v42 = vstv %s667_s27  ;;  %s1688_s25 = smov 17   ;;  %s2254_s26 = sld [smem:[#allocation28_spill]] }
  0x94   : > { %v2035_v20 = vrot.slane %v717_v16, %v2024_v15  ;;  %v726_v22 = vrot.slane %v713_v21, %v2024_v15  ;;  %vm669_vm6 = vcmp.eq.s32.totalorder %v668_v42, 1  ;;  %s2258_s23 = sld [smem:[#allocation30_spill]] }
  0x96   : > { %775 = vrot.lane.b32.xlu0 %v2035_v20, %s1682_s29 }
  0x99   : > { %1288 = vmatmul.mubr.msk.bf16.vlgmr.msra.gmra.mrb[4].mxu0 %vm522_vm3, %v509_v17 }
  0x9a   : > { %846 = vrot.lane.b32.xlu0 %v726_v22, %s1683_s17  ;;  %1303 = vmatprep.mubr.msk.bf16.mxu0 %vm1678_vm0, %v1677_v2 }
 0x100   : > { %v577_v23 = vpop.permute.xlu0 %576 }
 0x101   : > { %1280 = vmatpush3.bf16.msra.mxu1 %v577_v23 }
 0x102   : > { %1291 = vmatprep.subr.bf16.mxu1 %v1677_v2 }
 0x104   : > { %1282 = vmatmul.mubr.msk.bf16.vlgmr.msra.gmra.mrb[0].mxu1 %vm522_vm3, %v509_v17 }
 0x105   : > { %1297 = vmatprep.mubr.msk.bf16.mxu1 %vm1678_vm0, %v1677_v2  ;;  %vm931_vm0 = vcmask 293888  }
 0x111   : > { %v514_v24 = vpop.permute.xlu0 %513 }
 0x115   : > { %v776_v52 = vpop.permute.xlu0 %775 }
 0x116   : > { %v777_v14 = vrot.slane %v776_v52, 6 }
 0x119   : > { %v847_v55 = vpop.permute.xlu0 %846 }
 0x11a   : > { %v848_v58 = vrot.slane %v847_v55, 6 }
 0x11c   : > { %v849_v3 = vsel %vm793_vm9, %v848_v58, %v847_v55 }
 0x164   : > { %v560_v25 = vpop.f32.mrb[0].mxu0 }
 0x165   : > { %v1277_v26 = vpop.f32.mrb[1].mxu0  ;;  %v561_v27 = vadd.f32 %v560_v25, %v514_v24 }
 0x166   : > { %v563_v28 = vpop.f32.mrb[2].mxu0  ;;  %v779_v26 = vsel %vm778_vm13, %v777_v14, %v776_v52 }
 0x167   : > { %v1278_v29 = vpop.f32.mrb[3].mxu0  ;;  %v566_v30 = vmax.f32 %v561_v27, 0.0 }
 0x169   : > { %v690_v31 = vpack.c.bf16 %v566_v30, %v566_v30 }
 0x16b   : > { %691 = vst [vmem:[#allocation2 + $0x2] sm:$0x3] %v690_v31 }
 0x16c   : > { %v660_v33 = vpop.f32.mrb[4].mxu0 }
 0x16d   : > { %v661_v34 = vadd.f32 %v660_v33, %v514_v24  ;;  %v1289_v35 = vpop.f32.mrb[5].mxu0 }
 0x16e   : > { %v663_v36 = vpop.f32.mrb[6].mxu0  ;;  %v984_v35 = vld [vmem:[%s2208_s8 + $0x8] sm:$0xff] }
 0x16f   : > { %v666_v37 = vmax.f32 %v661_v34, 0.0  ;;  %v1290_v38 = vpop.f32.mrb[7].mxu0  ;;  %v910_v34 = vld [vmem:[%s2206_s6] sm:$0xf] }
 0x171   : > { %v674_v39 = vsel %vm673_vm4, 0.0, %v666_v37 }
 0x172   : > { %v821_v40 = vld [vmem:[#allocation2 + $0x2] sm:$0x3]  ;;  %v693_v41 = vpack.c.bf16 %v674_v39, %v674_v39 }
 0x173   : > { %822 = vst [vmem:[#allocation3 + $0x8] sm:$0x3] %v821_v40  ;;  %v1454_v32 = vld [vmem:[#allocation2 + $0x2] ss:$0 sps:$4 sm:$0xff]  }
 0x174   : > { %695 = vst.msk [vmem:[#allocation2 + $0x4] sm:$0x3] %vm694_vm5, %v693_v41  ;;  %v875_v33 = vrot.slane %v1454_v32, %v2024_v15 }
 0x17b   : > { %v845_v1 = vld [vmem:[#allocation2 + $0x2] sm:$0xf] }
 0x17c   : > { %v851_v8 = vmul.bf16 %v849_v3, %v845_v1  ;;  %v823_v9 = vld [vmem:[#allocation2 + $0x2] sm:$0xf] }
 0x1d7   : > { %v613_v43 = vpop.f32.mrb[0].mxu1 }
 0x1d8   : > { %v614_v44 = vadd.f32 %v613_v43, %v514_v24  ;;  %v1283_v45 = vpop.f32.mrb[1].mxu1 }
 0x1d9   : > { %v616_v46 = vpop.f32.mrb[2].mxu1 }
 0x1da   : > { %v619_v47 = vmax.f32 %v614_v44, 0.0  ;;  %v1284_v48 = vpop.f32.mrb[3].mxu1 }
 0x1dc   : > { %v670_v49 = vsel %vm669_vm6, 0.0, %v619_v47 }
 0x1dd   : > { %v676_v50 = vpack.c.bf16 %v670_v49, %v670_v49 }
 0x1df   : > { %v684_v51 = vrot.slane %v676_v50, %v2024_v15 }
 0x1e1   : > { %685 = vrot.lane.b32.xlu1 %v684_v51, %s1684_s30 }
 0x1e5   : > { %798 = vrot.lane.b32.xlu1 %v726_v22, %s1685_s15 }
 0x1e9   : > { %727 = vrot.lane.b32.xlu1 %v726_v22, %s1686_s28  ;;  %v859_v22 = vrot.slane %v851_v8, %v2024_v15 }
 0x1ed   : > { %824 = vrot.lane.b32.xlu1 %v2035_v20, %s1687_s20 }
 0x1f1   : > { %884 = vrot.lane.b32.xlu1 %v2035_v20, %s1688_s25  ;;  %v883_v20 = vld [vmem:[#allocation2 + $0x2] sm:$0xf] }
 0x253   : > { %v686_v53 = vpop.permute.xlu1 %685 }
 0x254   : > { %689 = vst.msk [vmem:[#allocation2] sm:$0x3] %vm688_vm7, %v686_v53 }
 0x257   : > { %v799_v54 = vpop.permute.xlu1 %798 }
 0x258   : > { %v800_v56 = vrot.slane %v799_v54, 6 }
 0x25a   : > { %v802_v57 = vsel %vm801_vm8, %v800_v56, %v799_v54 }
 0x25b   : > { %v797_v59 = vld [vmem:[#allocation2] sm:$0xf]  ;;  %v728_v60 = vpop.permute.xlu1 %727 }
 0x25c   : > { %v804_v61 = vmul.bf16 %v802_v57, %v797_v59  ;;  %v1453_v62 = vld [vmem:[#allocation2] ss:$0 sps:$4 sm:$0xff]   ;;  %v729_v5 = vrot.slane %v728_v60, 6 }
 0x25d   : > { %v758_v0 = vrot.slane %v1453_v62, %v2024_v15  ;;  %v718_v19 = vld [vmem:[#allocation2] sm:$0xf] }
 0x25e   : > { %v806_v63 = vcombine.low %v804_v61, %v804_v61  ;;  %v731_v16 = vsel %vm730_vm11, %v729_v5, %v728_v60  ;;  %v766_v27 = vld [vmem:[#allocation2] sm:$0xf] }
 0x25f   : > { %v825_v4 = vpop.permute.xlu1 %824  ;;  %759 = vrot.lane.b32.xlu1 %v758_v0, %s1681_s9  ;;  %v733_v23 = vmul.bf16 %v731_v16, %v718_v19  ;;  %v781_v30 = vmul.bf16 %v779_v26, %v766_v27  ;;  %v983_v0 = vld [vmem:[%s2208_s8] sm:$0xff]  ;;  %v1049_v16 = vunpack.c.h.bf16 %v2017_v12 }
 0x260   : > { %v826_v6 = vrot.slane %v825_v4, 6  ;;  %v813_v7 = vrot.slane %v806_v63, %v2024_v15  ;;  %v904_v63 = vld [vmem:[%s2254_s26] sm:$0x3]  ;;  %s1689_s26 = smov [#allocation10]  }
 0x261   : > { %v741_v29 = vrot.slane %v733_v23, %v2024_v15  ;;  %v789_v31 = vrot.slane %v781_v30, %v2024_v15  ;;  %s1520_s5 = sshll.u32 %s1689_s26, 4  ;;  %s1521_s5 = int_to_ptr.vmem [resolvable:$false] %s1520_s5 }
 0x262   : > { %v827_v10 = vsel %vm817_vm10, %v826_v6, %v825_v4 }
 0x263   : > { %v829_v11 = vmul.bf16 %v827_v10, %v823_v9  ;;  %v885_v13 = vpop.permute.xlu1 %884  ;;  %814 = vrot.lane.b32.xlu1 %v813_v7, %s1687_s20  ;;  %s2257_s20 = sld [smem:[#allocation24_spill]] }
 0x264   : > { %v886_v17 = vrot.slane %v885_v13, 6 }
 0x265   : > { %v831_v18 = vcombine.low %v829_v11, %v829_v11 }
 0x266   : > { %v887_v21 = vsel %vm745_vm12, %v886_v17, %v885_v13  ;;  %v1048_v13 = vunpack.c.l.bf16 %v2017_v12 }
 0x267   : > { %v889_v24 = vmul.bf16 %v887_v21, %v883_v20  ;;  %v838_v25 = vrot.slane %v831_v18, %v2024_v15  ;;  %860 = vrot.lane.b32.xlu1 %v859_v22, %s1682_s29  ;;  %s1522_s29 = scalar_lea.vmem %s1521_s5, 256 }
 0x269   : > { %839 = vrot.lane.b32.xlu0 %v838_v25, %s1685_s15  ;;  %v897_v28 = vrot.slane %v889_v24, %v2024_v15  ;;  %p2259_p3 = scmp.ne.s32.totalorder %s2257_s20, 0 }
 0x26b   : > { %898 = vrot.lane.b32.xlu1 %v897_v28, %s1686_s28 }
 0x26d   : > { %742 = vrot.lane.b32.xlu0 %v741_v29, %s1688_s25  ;;  %s497_s25 = scalar_lea.vmem [#allocation10], %s1991_s19 }
 0x26e   : > { %s1079_s13 = sshll.u32 %s497_s25, 4  ;;  %s2115_s13 = int_to_ptr.vmem [resolvable:$true] %s1079_s13 }
 0x26f   : > { %987 = vperm.xlu1 %1449, %v983_v0   ;;  %s1516_s19 = scalar_lea.vmem %s2115_s13, 128  ;;  %p1523_p7 = scmp.lt.s32.totalorder %s2115_s13, %s1521_s5 }
 0x270   : > { %p1517_p1 = scmp.ne.s32.totalorder %s2115_s13, %s1516_s19  ;;  %p1524_p4 = scmp.lt.s32.totalorder %s1522_s29, %s1516_s19 }
 0x271   : > { %790 = vrot.lane.b32.xlu0 %v789_v31, %s1683_s17  ;;  %s2255_s17 = sld [smem:[#allocation17_spill]] }
 0x272   : > { %p1518_p11 = pnand %p1517_p1, %p2259_p3  ;;  %p1525_p2 = por %p1524_p4, %p1523_p7 }
 0x274   : > { %p1519_p12 = pneg %p1518_p11 }
 0x275   : > { %876 = vrot.lane.b32.xlu0 %v875_v33, %s1684_s30  ;;  %s2256_s30 = sld [smem:[#allocation29_spill]] }
 0x276   : > { %p1526_p8 = pnand %p1525_p2, %p1519_p12 }
 0x277   : > { %s1250_s15 = sshll.u32 %s2255_s17, 2 }
 0x278   : > { %s1076_s28 = sadd.s32 %s1654_s18, %s1250_s15  ;;  %s2124_s18 = scalar_lea.sflag [#allocation7], %s435_s24 }
 0x279   : > { %913 = vperm.xlu0 %1448, %v910_v34   ;;  %s1251_s7 = sshll.u32 %s1076_s28, 6 }
 0x27a   : > { %s2120_s1 = scalar_lea.hbm %s2258_s23, %s1251_s7 }
 0x27b   : > { %v1458_v10 = vld [vmem:[%s2256_s30] sm:$0xff]  }
 0x27d   : > { %992 = vperm.xlu0 %1448, %v984_v35  }
 0x2d1   : > { %v760_v36 = vpop.permute.xlu1 %759 }
 0x2d2   : > { %v761_v37 = vrot.slane %v760_v36, 4 }
 0x2d4   : > { %v763_v38 = vsel %vm522_vm3, %v760_v36, %v761_v37 }
 0x2d5   : > { %765 = vst [vmem:[#allocation3] sm:$0xc] %v763_v38  ;;  %v815_v39 = vpop.permute.xlu1 %814 }
 0x2d6   : > { %v816_v40 = vrot.slane %v815_v39, 4 }
 0x2d8   : > { %v818_v15 = vsel %vm817_vm10, %v815_v39, %v816_v40 }
 0x2d9   : > { %820 = vst [vmem:[#allocation3 + $0x4] sm:$0xc] %v818_v15  ;;  %v861_v41 = vpop.permute.xlu1 %860 }
 0x2da   : > { %v862_v42 = vrot.slane %v861_v41, 4 }
 0x2db   : > { %v840_v43 = vpop.permute.xlu0 %839 }
 0x2dc   : > { %v841_v44 = vrot.slane %v840_v43, 4  ;;  %v863_v45 = vsel %vm778_vm13, %v861_v41, %v862_v42 }
 0x2dd   : > { %865 = vst [vmem:[#allocation3 + $0xc] sm:$0x3] %v863_v45  ;;  %v899_v47 = vpop.permute.xlu1 %898 }
 0x2de   : > { %v842_v46 = vsel %vm801_vm8, %v840_v43, %v841_v44  ;;  %v900_v48 = vrot.slane %v899_v47, 4 }
 0x2df   : > { %844 = vst [vmem:[#allocation3 + $0x8] sm:$0xc] %v842_v46  ;;  %v743_v49 = vpop.permute.xlu0 %742 }
 0x2e0   : > { %v744_v50 = vrot.slane %v743_v49, 4  ;;  %v901_v51 = vsel %vm730_vm11, %v899_v47, %v900_v48 }
 0x2e1   : > { %903 = vst [vmem:[#allocation3 + $0x10] sm:$0x3] %v901_v51 }
 0x2e2   : > { %v746_v52 = vsel %vm745_vm12, %v743_v49, %v744_v50 }
 0x2e3   : > { %748 = vst [vmem:[#allocation3] sm:$0x3] %v746_v52  ;;  %v791_v53 = vpop.permute.xlu0 %790 }
 0x2e4   : > { %v792_v54 = vrot.slane %v791_v53, 4 }
 0x2e6   : > { %v794_v55 = vsel %vm793_vm9, %v791_v53, %v792_v54 }
 0x2e7   : > { %796 = vst [vmem:[#allocation3 + $0x4] sm:$0x3] %v794_v55  ;;  %v877_v56 = vpop.permute.xlu0 %876 }
 0x2e8   : > { %v878_v57 = vrot.slane %v877_v56, 4  ;;  %v1457_v61 = vld [vmem:[#allocation3 + $0x10] ss:$0 sps:$4 sm:$0x33]  }
 0x2e9   : > { %v937_v62 = vsel %vm935_vm15, %v1457_v61, 0 }
 0x2ea   : > { %v880_v58 = vsel %vm879_vm14, %v877_v56, %v878_v57 }
 0x2eb   : > { %882 = vst [vmem:[#allocation3 + $0xc] sm:$0xc] %v880_v58 }
 0x2ee   : > { %v1455_v59 = vld [vmem:[#allocation3] sm:$0xff]   ;;  %v988_v11 = vpop.permute.xlu1 %987 }
 0x2ef   : > { %1292 = vmatpush3.bf16.msra.mxu1 %v1455_v59 }
 0x2f0   : > { %1293 = vmatprep.subr.bf16.mxu1 %v1677_v2 }
 0x2f2   : > { %v1456_v60 = vld [vmem:[#allocation3 + $0x8] sm:$0xff]  }
 0x2f3   : > { %1294 = vmatpush3.bf16.msra.mxu1 %v1456_v60 }
 0x2f4   : > { %1295 = vmatprep.subr.bf16.mxu1 %v1677_v2 }
 0x2f7   : > { %1296 = vmatpush3.bf16.msra.mxu1 %v937_v62 }
 0x2f8   : > { %v914_v1 = vpop.permute.xlu0 %913 }
 0x2fa   : > { %1298 = vmatmul.mubr.msk.bf16.vlgmr.msra.gmra.mrb[4].mxu1 %vm931_vm0, %v904_v63 }
 0x2fc   : > { %v993_v19 = vpop.permute.xlu0 %992 }
 0x3cd   : > { %v973_v3 = vpop.f32.mrb[4].mxu1 }
 0x3ce   : > { %v974_v4 = vadd.f32 %v973_v3, %v914_v1  ;;  %v1299_v5 = vpop.f32.mrb[5].mxu1 }
 0x3cf   : > { %v976_v2 = vpop.f32.mrb[6].mxu1 }
 0x3d0   : > { %v979_v6 = vmax.f32 %v974_v4, 0.0  ;;  %v1300_v7 = vpop.f32.mrb[7].mxu1 }
 0x3d2   : > { %v982_v8 = vpack.c.bf16 %v979_v6, %v979_v6 }
 0x3d4   : > { %v1005_v9 = vsel %vm935_vm15, %v982_v8, 0 }
 0x3d5   : > { %1302 = vmatpush3.bf16.msra.mxu0 %v1005_v9 }
 0x3d8   : > { %1304 = vmatmul.mubr.msk.bf16.vlgmr.msra.gmra.mrb[8].mxu0 %vm1000_vm1, %v1458_v10 }
 0x4ab   : > { %v1041_v14 = vpop.f32.mrb[8].mxu0 }
 0x4ac   : > { %v1305_v17 = vpop.f32.mrb[9].mxu0  ;;  %v1042_v18 = vadd.f32 %v1041_v14, %v988_v11 }
 0x4ad   : > { %v1044_v20 = vpop.f32.mrb[10].mxu0 }
 0x4ae   : > { %v1050_v21 = vadd.f32 %v1048_v13, %v1042_v18  ;;  %v1045_v22 = vadd.f32 %v1044_v20, %v993_v19  ;;  %v1306_v23 = vpop.f32.mrb[11].mxu0 }
 0x4b0   : > { %v1051_v24 = vadd.f32 %v1049_v16, %v1045_v22  ;;  %v1052_v25 = vmax.f32 %v1050_v21, 0.0 }
 0x4b2   : > { %v1053_v26 = vmax.f32 %v1051_v24, 0.0 }
 0x4b4   : > { %v1259_v12 = vpack.c.bf16 %v1053_v26, %v1052_v25 }
 0x4b6   : > { %1260 = vst [vmem:[%s497_s25] sm:$0xff] %v1259_v12  }
 0x4b7   : > { %1529 = shalt.err (!%p1526_p8)
}
 0x4b8   : > { %s1530_s24 = scalar_lea.hbm %s2120_s1, 128  ;;  %s1534_s27 = scalar_lea.hbm %s2258_s23, 512 }
 0x4b9   : > { %p1531_p9 = scmp.ne.s32.totalorder %s2120_s1, %s1530_s24  ;;  %p1535_p5 = scmp.lt.u32.totalorder %s2120_s1, %s2258_s23 }
 0x4ba   : > { %p1536_p6 = scmp.lt.u32.totalorder %s1534_s27, %s1530_s24  ;;  %p1538_p1 = scmp.lt.u32.totalorder %s1530_s24, %s2120_s1 }
 0x4bb   : > { %p1532_p13 = pnand %p1531_p9, %p2259_p3 }
 0x4bc   : > { %p1537_p10 = por %p1536_p6, %p1535_p5 }
 0x4bd   : > { %p1533_p0 = pneg %p1532_p13 }
 0x4be   : > { %p1539_p11 = por %p1538_p1, %p1537_p10 }
 0x4c0   : > { %p1540_p12 = pnand %p1539_p11, %p1533_p0 }
 0x4c2   : > { %1543 = shalt.err (!%p1540_p12)
}
 0x4c3   : > { %s1690_s28 = smov 64   ;;  %s1691_s25 = smov 128  }
 0x4c4   : > { %s1692_s7 = smov 4  }
 0x4c5   : > { %1311 = dma.vmem_to_hbm [thread:$0]  (%p2259_p3), %s2115_s13, 128, %s2120_s1, %s2124_s18, %s1690_s28, %s1691_s25, %s1692_s7  }
 0x4c6 PF: > { %s2260_s0 = sld [smem:[#allocation14_spill]]  ;;  %s2261_s9 = sld [smem:[#allocation25_spill]] }
 0x4c7   : > { %p1317_p7 = scmp.ge.s32.totalorder %s1670_s22, 2 }
 0x4cc   : > { %s1094_s19 = sand.u32 1, %s2260_s0   ;;  %p2262_p4 = scmp.ne.s32.totalorder %s2261_s9, 0 }
 0x4cd   : > { %s1095_s26 = scalar_lea.sflag [#allocation7], %s1094_s19 }
 0x4ce   : > { %p1314_p2 = pnand %p1317_p7, %p2262_p4 }
 0x4d0   : > { %1609 = dma.done.wait (!%p1314_p2), %s1095_s26, 128  }
 0x4d1   : > { %1611 = vsyncadd (!%p1314_p2), %s1095_s26, 4294967168  ;;  %s28_s22 = sadd.s32 1, %s1670_s22   ;;  %s2264_s20 = sld [smem:[#allocation23_spill]] }
 0x4d2   : > { %p2153_p8 = scmp.ge.s32.totalorder %s28_s22, 6   ;;  %s2265_s1 = sld [smem:[#allocation15_spill]] }
 0x4d3   : > { %s2266_s15 = sld [smem:[#allocation22_spill]]  ;;  %s2267_s18 = sld [smem:[#allocation16_spill]] }
 0x4d4   : > { %s2268_s17 = sld [smem:[#allocation21_spill]]  ;;  %s2269_s29 = sld [smem:[#allocation18_spill]] }
 0x4d5   : > { %s2270_s24 = sld [smem:[#allocation19_spill]]  ;;  %s2271_s27 = sld [smem:[#allocation20_spill]] }
 0x4d6   : > { %s2272_s30 = smov %s1646_s16  ;;  %s2273_s10 = smov %s1626_s11 }
 0x4d7   : > { %s2274_s11 = smov %s1630_s12  ;;  %s2275_s12 = smov %s2264_s20 }
 0x4d8   : > { %s2276_s13 = smov %s1638_s14  ;;  %s2277_s14 = smov %s2265_s1 }
 0x4d9   : > { %s2278_s16 = smov %s2267_s18  ;;  %s2280_s19 = smov %s1666_s21 }
 0x4da   : > { %s2279_s18 = smov %s2269_s29  ;;  %27 = sbr.rel (!%p2153_p8) target bundleno = 18 (0x12), region = 163 }
 0x4db   : > { %s2281_s20 = smov %s2270_s24  ;;  %s2282_s21 = smov %s2271_s27 }
 0x4e1   :  { %1100 = vsyncpa [#allocation6], 1 }
 0x4e2   :  { %1102 = vsyncpa [#allocation6 + $0x1], 1 }
 0x4e3   :  { %1103 = vsyncpa [#allocation9], 1 }
 0x4e4   :  { %1105 = vsyncpa [#allocation9 + $0x1], 1 }
 0x4e5   :  { %1106 = vsyncpa [#allocation7], 1 }
 0x4e6   :  { %1108 = vsyncpa [#allocation7 + $0x1], 1 }

</bundles_post_ra>
